<compile_context>
chip_gen: v6e
topology: v6e:2x2x1
jax: 0.10.0
libtpu: 0.0.40
codegen_flags: <defaults>
</compile_context>

<pallas_src>
import functools
import math

import jax
import jax.numpy as jnp
from jax import lax
from jax.experimental import pallas as pl
from jax.experimental.pallas import tpu as pltpu

EPS = 1e-5  # nn.LayerNorm default eps


def decoder_block_kernel(xq_ref, xkv_ref,
                         wq_ref, wkv_ref, wo_ref,
                         bq_ref, bkv_ref, bo_ref,
                         w1_ref, b1_ref, w2_ref, b2_ref,
                         gamma_ref, beta_ref,
                         out_ref, attn_ref,
                         *, num_heads, seq_len, q_tile, model_dim):
    H, S, Tq, D = num_heads, seq_len, q_tile, model_dim
    dh = D // H
    q0 = pl.program_id(1) * Tq          # absolute position of the first query row

    x_q = xq_ref[0].astype(jnp.float32)          # (Tq, D) residual rows, f32
    x_kv_bf = xkv_ref[0].astype(jnp.bfloat16)    # (S, D) full rows for K/V

    # ---- fused lane-dense projections (bf16 MXU operands, f32 accumulation) ----
    # 1/sqrt(dh) is folded into wq/bq in the wrapper.
    q = jnp.dot(x_q.astype(jnp.bfloat16), wq_ref[...],
                preferred_element_type=jnp.float32) + bq_ref[...]        # (Tq, D)
    kv = jnp.dot(x_kv_bf, wkv_ref[...],
                 preferred_element_type=jnp.float32) + bkv_ref[...]      # (S, 2D)

    q_bf = q.astype(jnp.bfloat16)
    k_bf = kv[:, :D].astype(jnp.bfloat16)
    v_bf = kv[:, D:].astype(jnp.bfloat16)

    # additive causal mask for this query tile (absolute positions)
    rows = lax.broadcasted_iota(jnp.int32, (Tq, S), 0) + q0
    cols = lax.broadcasted_iota(jnp.int32, (Tq, S), 1)
    neg_mask = jnp.where(rows >= cols, 0.0, -1e30).astype(jnp.float32)

    ctx_parts = []
    for h in range(H):                  # static unroll over heads; 2-D ops only
        lo = h * dh
        q_h = q_bf[:, lo:lo + dh]       # (Tq, dh)
        k_h = k_bf[:, lo:lo + dh]       # (S, dh)
        v_h = v_bf[:, lo:lo + dh]       # (S, dh)

        # q_h @ k_h^T (contract last dims, no materialized transpose)
        s_h = lax.dot_general(q_h, k_h, (((1,), (1,)), ((), ())),
                              preferred_element_type=jnp.float32) + neg_mask  # (Tq, S)
        m = jnp.max(s_h, axis=-1, keepdims=True)
        e = jnp.exp(s_h - m)
        denom = jnp.sum(e, axis=-1, keepdims=True)
        p_h = e / denom                 # exact normalization (rows sum to 1)
        attn_ref[0, h] = p_h.astype(attn_ref.dtype)

        ctx_parts.append(jnp.dot(p_h.astype(jnp.bfloat16), v_h,
                                 preferred_element_type=jnp.float32))   # (Tq, dh)

    # head-interleaved context (matches torch reshape(B,S,H,dh) -> (B,S,D))
    ctx = ctx_parts[0] if H == 1 else jnp.concatenate(ctx_parts, axis=-1)   # (Tq, D)
    # single full-contraction-depth output projection
    attn_out = jnp.dot(ctx.astype(jnp.bfloat16), wo_ref[...],
                       preferred_element_type=jnp.float32) + bo_ref[...]    # (Tq, D)

    gamma = gamma_ref[...]              # (1, D)
    beta = beta_ref[...]

    def layer_norm(y):
        mu = jnp.mean(y, axis=-1, keepdims=True)
        var = jnp.mean(jnp.square(y - mu), axis=-1, keepdims=True)
        return (y - mu) * lax.rsqrt(var + EPS) * gamma + beta

    # TODO(synk): nn.Dropout has no deterministic Pallas equivalent; treated as eval-mode identity.
    attn_norm = layer_norm(attn_out + x_q)                      # (Tq, D) f32

    # ---- MLP: Linear -> relu -> Linear (bf16 MXU operands, f32 accumulation) ----
    h1 = jnp.dot(attn_norm.astype(jnp.bfloat16), w1_ref[...],
                 preferred_element_type=jnp.float32) + b1_ref[...]
    h1 = jnp.maximum(h1, 0.0)
    mlp_out = jnp.dot(h1.astype(jnp.bfloat16), w2_ref[...],
                      preferred_element_type=jnp.float32) + b2_ref[...]

    ff_norm = layer_norm(mlp_out + attn_norm)
    out_ref[0] = ff_norm.astype(out_ref.dtype)


def _const_spec(shape):
    n = len(shape)
    return pl.BlockSpec(shape, lambda *args, _n=n: (0,) * _n)   # DMA'd once (constant index)


def regressive_block(x, params, num_heads, q_tile=None, attn_dtype=jnp.float32,
                     vmem_limit_bytes=None):
    (wq, wk, wv, wo, bq, bk, bv, bo, w1, b1, w2, b2, gamma, beta) = params
    B, S, D = x.shape
    H = num_heads
    assert D % H == 0
    dh = D // H
    if q_tile is None:
        # bound the (H, Tq, S) score tensor / per-step VMEM and give the pipeline
        # (and v7x's 2 TensorCores) enough grid steps.
        q_tile = S if S <= 128 else 128
    assert S % q_tile == 0
    Tq = q_tile

    cdt = jnp.bfloat16
    inv = 1.0 / math.sqrt(dh)
    # One-time wrapper-side weight prep: fold the 1/sqrt(dh) scale into the Q
    # projection, fuse K|V, and cast matmul weights to bf16 (half the weight DMA).
    wq_s = (wq * inv).astype(cdt)                          # (D, D)
    bq_s = bq * inv                                        # (1, D) f32
    wkv = jnp.concatenate([wk, wv], axis=1).astype(cdt)    # (D, 2D)
    bkv = jnp.concatenate([bk, bv], axis=1)                # (1, 2D) f32
    wo_c = wo.astype(cdt)
    w1_c = w1.astype(cdt)
    w2_c = w2.astype(cdt)

    kernel_params = (wq_s, wkv, wo_c, bq_s, bkv, bo,
                     w1_c, b1, w2_c, b2, gamma, beta)

    kernel = functools.partial(decoder_block_kernel, num_heads=H,
                               seq_len=S, q_tile=Tq, model_dim=D)

    in_specs = [
        pl.BlockSpec((1, Tq, D), lambda b, qi: (b, qi, 0)),   # query / residual rows
        pl.BlockSpec((1, S, D), lambda b, qi: (b, 0, 0)),     # full rows for K/V
    ]
    in_specs += [_const_spec(p.shape) for p in kernel_params]

    out_specs = (pl.BlockSpec((1, Tq, D), lambda b, qi: (b, qi, 0)),
                 pl.BlockSpec((1, H, Tq, S), lambda b, qi: (b, 0, qi, 0)))
    out_shape = (jax.ShapeDtypeStruct((B, S, D), x.dtype),
                 jax.ShapeDtypeStruct((B, H, S, S), attn_dtype))

    return pl.pallas_call(
        kernel,
        grid=(B, S // Tq),
        in_specs=in_specs,
        out_specs=out_specs,
        out_shape=out_shape,
        compiler_params=pltpu.CompilerParams(
            dimension_semantics=("parallel", "parallel"),
            vmem_limit_bytes=vmem_limit_bytes),   # raise / size Tq per generation (v5e 16MiB, v7x 32MiB scoped defaults)
    )(x, x, *kernel_params)


def reference(x, params, num_heads):
    (wq, wk, wv, wo, bq, bk, bv, bo, w1, b1, w2, b2, gamma, beta) = params
    B, S, D = x.shape
    dh = D // num_heads

    def ln(y):
        mu = jnp.mean(y, axis=-1, keepdims=True)
        var = jnp.mean((y - mu) ** 2, axis=-1, keepdims=True)
        return (y - mu) / jnp.sqrt(var + EPS) * gamma[0] + beta[0]

    q = x @ wq + bq[0]
    k = x @ wk + bk[0]
    v = x @ wv + bv[0]
    qh = q.reshape(B, S, num_heads, dh).transpose(0, 2, 1, 3)
    kh = k.reshape(B, S, num_heads, dh).transpose(0, 2, 1, 3)
    vh = v.reshape(B, S, num_heads, dh).transpose(0, 2, 1, 3)
    s = jnp.einsum('bhqd,bhkd->bhqk', qh, kh) / jnp.sqrt(dh)
    mask = jnp.tril(jnp.ones((S, S), dtype=bool))
    s = jnp.where(mask, s, -jnp.inf)
    p = jax.nn.softmax(s, axis=-1)
    ctx = jnp.einsum('bhqk,bhkd->bhqd', p, vh).transpose(0, 2, 1, 3).reshape(B, S, D)
    attn_out = ctx @ wo + bo[0]
    attn_norm = ln(attn_out + x)
    mlp_out = jnp.maximum(attn_norm @ w1 + b1[0], 0.0) @ w2 + b2[0]
    return ln(mlp_out + attn_norm), p


if __name__ == "__main__":
    B, S, D, H, EF = 2, 8, 32, 4, 4   # batch, seq (= max_len), embedding_dim, num_heads, expansion

    key = jax.random.PRNGKey(0)
    ks = jax.random.split(key, 16)
    scale = 0.05

    wq = scale * jax.random.normal(ks[0], (D, D), jnp.float32)
    wk = scale * jax.random.normal(ks[1], (D, D), jnp.float32)
    wv = scale * jax.random.normal(ks[2], (D, D), jnp.float32)
    wo = scale * jax.random.normal(ks[3], (D, D), jnp.float32)
    bq = scale * jax.random.normal(ks[4], (1, D), jnp.float32)
    bk = scale * jax.random.normal(ks[5], (1, D), jnp.float32)
    bv = scale * jax.random.normal(ks[6], (1, D), jnp.float32)
    bo = scale * jax.random.normal(ks[7], (1, D), jnp.float32)
    w1 = scale * jax.random.normal(ks[8], (D, D * EF), jnp.float32)
    b1 = scale * jax.random.normal(ks[9], (1, D * EF), jnp.float32)
    w2 = scale * jax.random.normal(ks[10], (D * EF, D), jnp.float32)
    b2 = scale * jax.random.normal(ks[11], (1, D), jnp.float32)
    gamma = jnp.ones((1, D), jnp.float32)
    beta = jnp.zeros((1, D), jnp.float32)

    params = (wq, wk, wv, wo, bq, bk, bv, bo, w1, b1, w2, b2, gamma, beta)

    x = jax.random.normal(ks[12], (B, S, D), jnp.float32)

    out, attn = regressive_block(x, params, num_heads=H)
    out = jax.block_until_ready(out)
    attn = jax.block_until_ready(attn)

    ref_out, ref_attn = reference(x, params, num_heads=H)
    assert out.shape == (B, S, D) and attn.shape == (B, H, S, S)
    # bf16 MXU operands -> looser tolerances than the f32 reference
    assert jnp.allclose(out, ref_out, atol=3e-2, rtol=3e-2), \
        float(jnp.max(jnp.abs(out - ref_out)))
    assert jnp.allclose(attn, ref_attn, atol=2e-2, rtol=2e-2), \
        float(jnp.max(jnp.abs(attn - ref_attn)))

    print("KERNEL_OK")
</pallas_src>

<mosaic_0001>
module attributes {stable_mosaic.version = 11 : i64} {
  func.func @decoder_block_kernel(%arg0: i32, %arg1: i32, %arg2: memref<1x8x32xf32, #tpu.memory_space<vmem>>, %arg3: memref<1x8x32xf32, #tpu.memory_space<vmem>>, %arg4: memref<32x32xbf16, #tpu.memory_space<vmem>>, %arg5: memref<32x64xbf16, #tpu.memory_space<vmem>>, %arg6: memref<32x32xbf16, #tpu.memory_space<vmem>>, %arg7: memref<1x32xf32, #tpu.memory_space<vmem>>, %arg8: memref<1x64xf32, #tpu.memory_space<vmem>>, %arg9: memref<1x32xf32, #tpu.memory_space<vmem>>, %arg10: memref<32x128xbf16, #tpu.memory_space<vmem>>, %arg11: memref<1x128xf32, #tpu.memory_space<vmem>>, %arg12: memref<128x32xbf16, #tpu.memory_space<vmem>>, %arg13: memref<1x32xf32, #tpu.memory_space<vmem>>, %arg14: memref<1x32xf32, #tpu.memory_space<vmem>>, %arg15: memref<1x32xf32, #tpu.memory_space<vmem>>, %arg16: memref<1x8x32xf32, #tpu.memory_space<vmem>>, %arg17: memref<1x4x8x8xf32, #tpu.memory_space<vmem>>) attributes {dimension_semantics = [#tpu.dimension_semantics<parallel>, #tpu.dimension_semantics<parallel>], iteration_bounds = array<i64: 2, 1>, scalar_prefetch = 0 : i64, scratch_operands = 0 : i64, tpu.core_type = #tpu.core_type<tc>, window_params = [{transform_indices = @transform_0, window_bounds = array<i64: 1, 8, 32>}, {transform_indices = @transform_1, window_bounds = array<i64: 1, 8, 32>}, {pipeline_mode = #tpu.pipeline_mode<synchronous>, transform_indices = @transform_2, window_bounds = array<i64: 32, 32>}, {pipeline_mode = #tpu.pipeline_mode<synchronous>, transform_indices = @transform_3, window_bounds = array<i64: 32, 64>}, {pipeline_mode = #tpu.pipeline_mode<synchronous>, transform_indices = @transform_4, window_bounds = array<i64: 32, 32>}, {pipeline_mode = #tpu.pipeline_mode<synchronous>, transform_indices = @transform_5, window_bounds = array<i64: 1, 32>}, {pipeline_mode = #tpu.pipeline_mode<synchronous>, transform_indices = @transform_6, window_bounds = array<i64: 1, 64>}, {pipeline_mode = #tpu.pipeline_mode<synchronous>, transform_indices = @transform_7, window_bounds = array<i64: 1, 32>}, {pipeline_mode = #tpu.pipeline_mode<synchronous>, transform_indices = @transform_8, window_bounds = array<i64: 32, 128>}, {pipeline_mode = #tpu.pipeline_mode<synchronous>, transform_indices = @transform_9, window_bounds = array<i64: 1, 128>}, {pipeline_mode = #tpu.pipeline_mode<synchronous>, transform_indices = @transform_10, window_bounds = array<i64: 128, 32>}, {pipeline_mode = #tpu.pipeline_mode<synchronous>, transform_indices = @transform_11, window_bounds = array<i64: 1, 32>}, {pipeline_mode = #tpu.pipeline_mode<synchronous>, transform_indices = @transform_12, window_bounds = array<i64: 1, 32>}, {pipeline_mode = #tpu.pipeline_mode<synchronous>, transform_indices = @transform_13, window_bounds = array<i64: 1, 32>}, {transform_indices = @transform_14, window_bounds = array<i64: 1, 8, 32>}, {transform_indices = @transform_15, window_bounds = array<i64: 1, 4, 8, 8>}]} {
    %c8_i32 = arith.constant 8 : i32
    %0 = arith.muli %arg1, %c8_i32 : i32
    %c0 = arith.constant 0 : index
    %c0_0 = arith.constant 0 : index
    %c0_1 = arith.constant 0 : index
    %1 = vector.load %arg2[%c0, %c0_0, %c0_1] : memref<1x8x32xf32, #tpu.memory_space<vmem>>, vector<1x8x32xf32>
    %2 = vector.shape_cast %1 : vector<1x8x32xf32> to vector<8x32xf32>
    %c0_2 = arith.constant 0 : index
    %c0_3 = arith.constant 0 : index
    %c0_4 = arith.constant 0 : index
    %3 = vector.load %arg3[%c0_2, %c0_3, %c0_4] : memref<1x8x32xf32, #tpu.memory_space<vmem>>, vector<1x8x32xf32>
    %4 = vector.shape_cast %3 : vector<1x8x32xf32> to vector<8x32xf32>
    %5 = arith.truncf %4 : vector<8x32xf32> to vector<8x32xbf16>
    %6 = arith.truncf %2 : vector<8x32xf32> to vector<8x32xbf16>
    %c0_5 = arith.constant 0 : index
    %c0_6 = arith.constant 0 : index
    %7 = vector.load %arg4[%c0_5, %c0_6] : memref<32x32xbf16, #tpu.memory_space<vmem>>, vector<32x32xbf16>
    %cst = arith.constant dense<0.000000e+00> : vector<8x32xf32>
    %8 = tpu.matmul %6, %7, %cst {dimension_numbers = #tpu.dot_dimension_numbers<[1], [0], [0], [1], [0, 0, 1, 1], [], []>} : vector<8x32xbf16>, vector<32x32xbf16>, vector<8x32xf32> -> vector<8x32xf32>
    %c0_7 = arith.constant 0 : index
    %c0_8 = arith.constant 0 : index
    %9 = vector.load %arg7[%c0_7, %c0_8] : memref<1x32xf32, #tpu.memory_space<vmem>>, vector<1x32xf32>
    %10 = vector.broadcast %9 : vector<1x32xf32> to vector<8x32xf32>
    %11 = arith.addf %8, %10 : vector<8x32xf32>
    %c0_9 = arith.constant 0 : index
    %c0_10 = arith.constant 0 : index
    %12 = vector.load %arg5[%c0_9, %c0_10] : memref<32x64xbf16, #tpu.memory_space<vmem>>, vector<32x64xbf16>
    %cst_11 = arith.constant dense<0.000000e+00> : vector<8x64xf32>
    %13 = tpu.matmul %5, %12, %cst_11 {dimension_numbers = #tpu.dot_dimension_numbers<[1], [0], [0], [1], [0, 0, 1, 1], [], []>} : vector<8x32xbf16>, vector<32x64xbf16>, vector<8x64xf32> -> vector<8x64xf32>
    %c0_12 = arith.constant 0 : index
    %c0_13 = arith.constant 0 : index
    %14 = vector.load %arg8[%c0_12, %c0_13] : memref<1x64xf32, #tpu.memory_space<vmem>>, vector<1x64xf32>
    %15 = vector.broadcast %14 : vector<1x64xf32> to vector<8x64xf32>
    %16 = arith.addf %13, %15 : vector<8x64xf32>
    %17 = arith.truncf %11 : vector<8x32xf32> to vector<8x32xbf16>
    %18 = vector.extract_strided_slice %16 {offsets = [0, 0], sizes = [8, 32], strides = [1, 1]} : vector<8x64xf32> to vector<8x32xf32>
    %19 = arith.truncf %18 : vector<8x32xf32> to vector<8x32xbf16>
    %20 = vector.extract_strided_slice %16 {offsets = [0, 32], sizes = [8, 32], strides = [1, 1]} : vector<8x64xf32> to vector<8x32xf32>
    %21 = arith.truncf %20 : vector<8x32xf32> to vector<8x32xbf16>
    %22 = tpu.iota {dimensions = array<i32: 0>} : vector<8x8xi32>
    %23 = vector.broadcast %0 : i32 to vector<8x8xi32>
    %24 = arith.addi %22, %23 : vector<8x8xi32>
    %25 = tpu.iota {dimensions = array<i32: 1>} : vector<8x8xi32>
    %26 = arith.cmpi sge, %24, %25 : vector<8x8xi32>
    %cst_14 = arith.constant 0.000000e+00 : f32
    %cst_15 = arith.constant -1.000000e+30 : f32
    %27 = vector.broadcast %cst_14 : f32 to vector<8x8xf32>
    %28 = vector.broadcast %cst_15 : f32 to vector<8x8xf32>
    %29 = arith.select %26, %27, %28 : vector<8x8xi1>, vector<8x8xf32>
    %30 = vector.extract_strided_slice %17 {offsets = [0, 0], sizes = [8, 8], strides = [1, 1]} : vector<8x32xbf16> to vector<8x8xbf16>
    %31 = vector.extract_strided_slice %19 {offsets = [0, 0], sizes = [8, 8], strides = [1, 1]} : vector<8x32xbf16> to vector<8x8xbf16>
    %32 = vector.extract_strided_slice %21 {offsets = [0, 0], sizes = [8, 8], strides = [1, 1]} : vector<8x32xbf16> to vector<8x8xbf16>
    %cst_16 = arith.constant dense<0.000000e+00> : vector<8x8xf32>
    %33 = tpu.matmul %30, %31, %cst_16 {dimension_numbers = #tpu.dot_dimension_numbers<[1], [1], [0], [0], [0, 0, 1, 0], [], []>} : vector<8x8xbf16>, vector<8x8xbf16>, vector<8x8xf32> -> vector<8x8xf32>
    %34 = arith.addf %33, %29 : vector<8x8xf32>
    %cst_17 = arith.constant dense<0xFF800000> : vector<8xf32>
    %35 = vector.multi_reduction <maximumf>, %34, %cst_17 [1] : vector<8x8xf32> to vector<8xf32>
    %36 = vector.shape_cast %35 : vector<8xf32> to vector<8x1xf32>
    %37 = vector.broadcast %36 : vector<8x1xf32> to vector<8x8xf32>
    %38 = arith.subf %34, %37 : vector<8x8xf32>
    %39 = math.exp %38 : vector<8x8xf32>
    %cst_18 = arith.constant dense<0.000000e+00> : vector<8xf32>
    %40 = vector.multi_reduction <add>, %39, %cst_18 [1] : vector<8x8xf32> to vector<8xf32>
    %41 = vector.shape_cast %40 : vector<8xf32> to vector<8x1xf32>
    %42 = vector.broadcast %41 : vector<8x1xf32> to vector<8x8xf32>
    %43 = arith.divf %39, %42 : vector<8x8xf32>
    %c0_19 = arith.constant 0 : index
    %c0_20 = arith.constant 0 : index
    %c0_21 = arith.constant 0 : index
    %c0_22 = arith.constant 0 : index
    %44 = vector.load %arg17[%c0_19, %c0_20, %c0_21, %c0_22] : memref<1x4x8x8xf32, #tpu.memory_space<vmem>>, vector<1x1x8x8xf32>
    %45 = vector.shape_cast %44 : vector<1x1x8x8xf32> to vector<8x8xf32>
    %46 = vector.shape_cast %43 : vector<8x8xf32> to vector<1x1x8x8xf32>
    tpu.vector_store %arg17[%c0_19, %c0_20, %c0_21, %c0_22], %46 {strides = array<i32>} : memref<1x4x8x8xf32, #tpu.memory_space<vmem>>, vector<1x1x8x8xf32>,
    %47 = arith.truncf %43 : vector<8x8xf32> to vector<8x8xbf16>
    %cst_23 = arith.constant dense<0.000000e+00> : vector<8x8xf32>
    %48 = tpu.matmul %47, %32, %cst_23 {dimension_numbers = #tpu.dot_dimension_numbers<[1], [0], [0], [1], [0, 0, 1, 1], [], []>} : vector<8x8xbf16>, vector<8x8xbf16>, vector<8x8xf32> -> vector<8x8xf32>
    %49 = vector.extract_strided_slice %17 {offsets = [0, 8], sizes = [8, 8], strides = [1, 1]} : vector<8x32xbf16> to vector<8x8xbf16>
    %50 = vector.extract_strided_slice %19 {offsets = [0, 8], sizes = [8, 8], strides = [1, 1]} : vector<8x32xbf16> to vector<8x8xbf16>
    %51 = vector.extract_strided_slice %21 {offsets = [0, 8], sizes = [8, 8], strides = [1, 1]} : vector<8x32xbf16> to vector<8x8xbf16>
    %cst_24 = arith.constant dense<0.000000e+00> : vector<8x8xf32>
    %52 = tpu.matmul %49, %50, %cst_24 {dimension_numbers = #tpu.dot_dimension_numbers<[1], [1], [0], [0], [0, 0, 1, 0], [], []>} : vector<8x8xbf16>, vector<8x8xbf16>, vector<8x8xf32> -> vector<8x8xf32>
    %53 = arith.addf %52, %29 : vector<8x8xf32>
    %cst_25 = arith.constant dense<0xFF800000> : vector<8xf32>
    %54 = vector.multi_reduction <maximumf>, %53, %cst_25 [1] : vector<8x8xf32> to vector<8xf32>
    %55 = vector.shape_cast %54 : vector<8xf32> to vector<8x1xf32>
    %56 = vector.broadcast %55 : vector<8x1xf32> to vector<8x8xf32>
    %57 = arith.subf %53, %56 : vector<8x8xf32>
    %58 = math.exp %57 : vector<8x8xf32>
    %cst_26 = arith.constant dense<0.000000e+00> : vector<8xf32>
    %59 = vector.multi_reduction <add>, %58, %cst_26 [1] : vector<8x8xf32> to vector<8xf32>
    %60 = vector.shape_cast %59 : vector<8xf32> to vector<8x1xf32>
    %61 = vector.broadcast %60 : vector<8x1xf32> to vector<8x8xf32>
    %62 = arith.divf %58, %61 : vector<8x8xf32>
    %c0_27 = arith.constant 0 : index
    %c1 = arith.constant 1 : index
    %c0_28 = arith.constant 0 : index
    %c0_29 = arith.constant 0 : index
    %63 = vector.load %arg17[%c0_27, %c1, %c0_28, %c0_29] : memref<1x4x8x8xf32, #tpu.memory_space<vmem>>, vector<1x1x8x8xf32>
    %64 = vector.shape_cast %63 : vector<1x1x8x8xf32> to vector<8x8xf32>
    %65 = vector.shape_cast %62 : vector<8x8xf32> to vector<1x1x8x8xf32>
    tpu.vector_store %arg17[%c0_27, %c1, %c0_28, %c0_29], %65 {strides = array<i32>} : memref<1x4x8x8xf32, #tpu.memory_space<vmem>>, vector<1x1x8x8xf32>,
    %66 = arith.truncf %62 : vector<8x8xf32> to vector<8x8xbf16>
    %cst_30 = arith.constant dense<0.000000e+00> : vector<8x8xf32>
    %67 = tpu.matmul %66, %51, %cst_30 {dimension_numbers = #tpu.dot_dimension_numbers<[1], [0], [0], [1], [0, 0, 1, 1], [], []>} : vector<8x8xbf16>, vector<8x8xbf16>, vector<8x8xf32> -> vector<8x8xf32>
    %68 = vector.extract_strided_slice %17 {offsets = [0, 16], sizes = [8, 8], strides = [1, 1]} : vector<8x32xbf16> to vector<8x8xbf16>
    %69 = vector.extract_strided_slice %19 {offsets = [0, 16], sizes = [8, 8], strides = [1, 1]} : vector<8x32xbf16> to vector<8x8xbf16>
    %70 = vector.extract_strided_slice %21 {offsets = [0, 16], sizes = [8, 8], strides = [1, 1]} : vector<8x32xbf16> to vector<8x8xbf16>
    %cst_31 = arith.constant dense<0.000000e+00> : vector<8x8xf32>
    %71 = tpu.matmul %68, %69, %cst_31 {dimension_numbers = #tpu.dot_dimension_numbers<[1], [1], [0], [0], [0, 0, 1, 0], [], []>} : vector<8x8xbf16>, vector<8x8xbf16>, vector<8x8xf32> -> vector<8x8xf32>
    %72 = arith.addf %71, %29 : vector<8x8xf32>
    %cst_32 = arith.constant dense<0xFF800000> : vector<8xf32>
    %73 = vector.multi_reduction <maximumf>, %72, %cst_32 [1] : vector<8x8xf32> to vector<8xf32>
    %74 = vector.shape_cast %73 : vector<8xf32> to vector<8x1xf32>
    %75 = vector.broadcast %74 : vector<8x1xf32> to vector<8x8xf32>
    %76 = arith.subf %72, %75 : vector<8x8xf32>
    %77 = math.exp %76 : vector<8x8xf32>
    %cst_33 = arith.constant dense<0.000000e+00> : vector<8xf32>
    %78 = vector.multi_reduction <add>, %77, %cst_33 [1] : vector<8x8xf32> to vector<8xf32>
    %79 = vector.shape_cast %78 : vector<8xf32> to vector<8x1xf32>
    %80 = vector.broadcast %79 : vector<8x1xf32> to vector<8x8xf32>
    %81 = arith.divf %77, %80 : vector<8x8xf32>
    %c0_34 = arith.constant 0 : index
    %c2 = arith.constant 2 : index
    %c0_35 = arith.constant 0 : index
    %c0_36 = arith.constant 0 : index
    %82 = vector.load %arg17[%c0_34, %c2, %c0_35, %c0_36] : memref<1x4x8x8xf32, #tpu.memory_space<vmem>>, vector<1x1x8x8xf32>
    %83 = vector.shape_cast %82 : vector<1x1x8x8xf32> to vector<8x8xf32>
    %84 = vector.shape_cast %81 : vector<8x8xf32> to vector<1x1x8x8xf32>
    tpu.vector_store %arg17[%c0_34, %c2, %c0_35, %c0_36], %84 {strides = array<i32>} : memref<1x4x8x8xf32, #tpu.memory_space<vmem>>, vector<1x1x8x8xf32>,
    %85 = arith.truncf %81 : vector<8x8xf32> to vector<8x8xbf16>
    %cst_37 = arith.constant dense<0.000000e+00> : vector<8x8xf32>
    %86 = tpu.matmul %85, %70, %cst_37 {dimension_numbers = #tpu.dot_dimension_numbers<[1], [0], [0], [1], [0, 0, 1, 1], [], []>} : vector<8x8xbf16>, vector<8x8xbf16>, vector<8x8xf32> -> vector<8x8xf32>
    %87 = vector.extract_strided_slice %17 {offsets = [0, 24], sizes = [8, 8], strides = [1, 1]} : vector<8x32xbf16> to vector<8x8xbf16>
    %88 = vector.extract_strided_slice %19 {offsets = [0, 24], sizes = [8, 8], strides = [1, 1]} : vector<8x32xbf16> to vector<8x8xbf16>
    %89 = vector.extract_strided_slice %21 {offsets = [0, 24], sizes = [8, 8], strides = [1, 1]} : vector<8x32xbf16> to vector<8x8xbf16>
    %cst_38 = arith.constant dense<0.000000e+00> : vector<8x8xf32>
    %90 = tpu.matmul %87, %88, %cst_38 {dimension_numbers = #tpu.dot_dimension_numbers<[1], [1], [0], [0], [0, 0, 1, 0], [], []>} : vector<8x8xbf16>, vector<8x8xbf16>, vector<8x8xf32> -> vector<8x8xf32>
    %91 = arith.addf %90, %29 : vector<8x8xf32>
    %cst_39 = arith.constant dense<0xFF800000> : vector<8xf32>
    %92 = vector.multi_reduction <maximumf>, %91, %cst_39 [1] : vector<8x8xf32> to vector<8xf32>
    %93 = vector.shape_cast %92 : vector<8xf32> to vector<8x1xf32>
    %94 = vector.broadcast %93 : vector<8x1xf32> to vector<8x8xf32>
    %95 = arith.subf %91, %94 : vector<8x8xf32>
    %96 = math.exp %95 : vector<8x8xf32>
    %cst_40 = arith.constant dense<0.000000e+00> : vector<8xf32>
    %97 = vector.multi_reduction <add>, %96, %cst_40 [1] : vector<8x8xf32> to vector<8xf32>
    %98 = vector.shape_cast %97 : vector<8xf32> to vector<8x1xf32>
    %99 = vector.broadcast %98 : vector<8x1xf32> to vector<8x8xf32>
    %100 = arith.divf %96, %99 : vector<8x8xf32>
    %c0_41 = arith.constant 0 : index
    %c3 = arith.constant 3 : index
    %c0_42 = arith.constant 0 : index
    %c0_43 = arith.constant 0 : index
    %101 = vector.load %arg17[%c0_41, %c3, %c0_42, %c0_43] : memref<1x4x8x8xf32, #tpu.memory_space<vmem>>, vector<1x1x8x8xf32>
    %102 = vector.shape_cast %101 : vector<1x1x8x8xf32> to vector<8x8xf32>
    %103 = vector.shape_cast %100 : vector<8x8xf32> to vector<1x1x8x8xf32>
    tpu.vector_store %arg17[%c0_41, %c3, %c0_42, %c0_43], %103 {strides = array<i32>} : memref<1x4x8x8xf32, #tpu.memory_space<vmem>>, vector<1x1x8x8xf32>,
    %104 = arith.truncf %100 : vector<8x8xf32> to vector<8x8xbf16>
    %cst_44 = arith.constant dense<0.000000e+00> : vector<8x8xf32>
    %105 = tpu.matmul %104, %89, %cst_44 {dimension_numbers = #tpu.dot_dimension_numbers<[1], [0], [0], [1], [0, 0, 1, 1], [], []>} : vector<8x8xbf16>, vector<8x8xbf16>, vector<8x8xf32> -> vector<8x8xf32>
    %106 = tpu.concatenate %48, %67, %86, %105 in 1 : vector<8x8xf32>, vector<8x8xf32>, vector<8x8xf32>, vector<8x8xf32> -> vector<8x32xf32>
    %107 = arith.truncf %106 : vector<8x32xf32> to vector<8x32xbf16>
    %c0_45 = arith.constant 0 : index
    %c0_46 = arith.constant 0 : index
    %108 = vector.load %arg6[%c0_45, %c0_46] : memref<32x32xbf16, #tpu.memory_space<vmem>>, vector<32x32xbf16>
    %cst_47 = arith.constant dense<0.000000e+00> : vector<8x32xf32>
    %109 = tpu.matmul %107, %108, %cst_47 {dimension_numbers = #tpu.dot_dimension_numbers<[1], [0], [0], [1], [0, 0, 1, 1], [], []>} : vector<8x32xbf16>, vector<32x32xbf16>, vector<8x32xf32> -> vector<8x32xf32>
    %c0_48 = arith.constant 0 : index
    %c0_49 = arith.constant 0 : index
    %110 = vector.load %arg9[%c0_48, %c0_49] : memref<1x32xf32, #tpu.memory_space<vmem>>, vector<1x32xf32>
    %111 = vector.broadcast %110 : vector<1x32xf32> to vector<8x32xf32>
    %112 = arith.addf %109, %111 : vector<8x32xf32>
    %c0_50 = arith.constant 0 : index
    %c0_51 = arith.constant 0 : index
    %113 = vector.load %arg14[%c0_50, %c0_51] : memref<1x32xf32, #tpu.memory_space<vmem>>, vector<1x32xf32>
    %c0_52 = arith.constant 0 : index
    %c0_53 = arith.constant 0 : index
    %114 = vector.load %arg15[%c0_52, %c0_53] : memref<1x32xf32, #tpu.memory_space<vmem>>, vector<1x32xf32>
    %115 = arith.addf %112, %2 : vector<8x32xf32>
    %cst_54 = arith.constant dense<0.000000e+00> : vector<8xf32>
    %116 = vector.multi_reduction <add>, %115, %cst_54 [1] : vector<8x32xf32> to vector<8xf32>
    %117 = vector.shape_cast %116 : vector<8xf32> to vector<8x1xf32>
    %cst_55 = arith.constant 3.200000e+01 : f32
    %118 = vector.broadcast %cst_55 : f32 to vector<8x1xf32>
    %119 = arith.divf %117, %118 : vector<8x1xf32>
    %120 = vector.broadcast %119 : vector<8x1xf32> to vector<8x32xf32>
    %121 = arith.subf %115, %120 : vector<8x32xf32>
    %122 = arith.mulf %121, %121 : vector<8x32xf32>
    %cst_56 = arith.constant dense<0.000000e+00> : vector<8xf32>
    %123 = vector.multi_reduction <add>, %122, %cst_56 [1] : vector<8x32xf32> to vector<8xf32>
    %124 = vector.shape_cast %123 : vector<8xf32> to vector<8x1xf32>
    %cst_57 = arith.constant 3.200000e+01 : f32
    %125 = vector.broadcast %cst_57 : f32 to vector<8x1xf32>
    %126 = arith.divf %124, %125 : vector<8x1xf32>
    %127 = vector.broadcast %119 : vector<8x1xf32> to vector<8x32xf32>
    %128 = arith.subf %115, %127 : vector<8x32xf32>
    %cst_58 = arith.constant 9.99999974E-6 : f32
    %129 = vector.broadcast %cst_58 : f32 to vector<8x1xf32>
    %130 = arith.addf %126, %129 : vector<8x1xf32>
    %131 = math.rsqrt %130 : vector<8x1xf32>
    %132 = vector.broadcast %131 : vector<8x1xf32> to vector<8x32xf32>
    %133 = arith.mulf %128, %132 : vector<8x32xf32>
    %134 = vector.broadcast %113 : vector<1x32xf32> to vector<8x32xf32>
    %135 = arith.mulf %133, %134 : vector<8x32xf32>
    %136 = vector.broadcast %114 : vector<1x32xf32> to vector<8x32xf32>
    %137 = arith.addf %135, %136 : vector<8x32xf32>
    %138 = arith.truncf %137 : vector<8x32xf32> to vector<8x32xbf16>
    %c0_59 = arith.constant 0 : index
    %c0_60 = arith.constant 0 : index
    %139 = vector.load %arg10[%c0_59, %c0_60] : memref<32x128xbf16, #tpu.memory_space<vmem>>, vector<32x128xbf16>
    %cst_61 = arith.constant dense<0.000000e+00> : vector<8x128xf32>
    %140 = tpu.matmul %138, %139, %cst_61 {dimension_numbers = #tpu.dot_dimension_numbers<[1], [0], [0], [1], [0, 0, 1, 1], [], []>} : vector<8x32xbf16>, vector<32x128xbf16>, vector<8x128xf32> -> vector<8x128xf32>
    %c0_62 = arith.constant 0 : index
    %c0_63 = arith.constant 0 : index
    %141 = vector.load %arg11[%c0_62, %c0_63] : memref<1x128xf32, #tpu.memory_space<vmem>>, vector<1x128xf32>
    %142 = vector.broadcast %141 : vector<1x128xf32> to vector<8x128xf32>
    %143 = arith.addf %140, %142 : vector<8x128xf32>
    %cst_64 = arith.constant 0.000000e+00 : f32
    %144 = vector.broadcast %cst_64 : f32 to vector<8x128xf32>
    %145 = arith.maximumf %143, %144 : vector<8x128xf32>
    %146 = arith.truncf %145 : vector<8x128xf32> to vector<8x128xbf16>
    %c0_65 = arith.constant 0 : index
    %c0_66 = arith.constant 0 : index
    %147 = vector.load %arg12[%c0_65, %c0_66] : memref<128x32xbf16, #tpu.memory_space<vmem>>, vector<128x32xbf16>
    %cst_67 = arith.constant dense<0.000000e+00> : vector<8x32xf32>
    %148 = tpu.matmul %146, %147, %cst_67 {dimension_numbers = #tpu.dot_dimension_numbers<[1], [0], [0], [1], [0, 0, 1, 1], [], []>} : vector<8x128xbf16>, vector<128x32xbf16>, vector<8x32xf32> -> vector<8x32xf32>
    %c0_68 = arith.constant 0 : index
    %c0_69 = arith.constant 0 : index
    %149 = vector.load %arg13[%c0_68, %c0_69] : memref<1x32xf32, #tpu.memory_space<vmem>>, vector<1x32xf32>
    %150 = vector.broadcast %149 : vector<1x32xf32> to vector<8x32xf32>
    %151 = arith.addf %148, %150 : vector<8x32xf32>
    %152 = arith.addf %151, %137 : vector<8x32xf32>
    %cst_70 = arith.constant dense<0.000000e+00> : vector<8xf32>
    %153 = vector.multi_reduction <add>, %152, %cst_70 [1] : vector<8x32xf32> to vector<8xf32>
    %154 = vector.shape_cast %153 : vector<8xf32> to vector<8x1xf32>
    %cst_71 = arith.constant 3.200000e+01 : f32
    %155 = vector.broadcast %cst_71 : f32 to vector<8x1xf32>
    %156 = arith.divf %154, %155 : vector<8x1xf32>
    %157 = vector.broadcast %156 : vector<8x1xf32> to vector<8x32xf32>
    %158 = arith.subf %152, %157 : vector<8x32xf32>
    %159 = arith.mulf %158, %158 : vector<8x32xf32>
    %cst_72 = arith.constant dense<0.000000e+00> : vector<8xf32>
    %160 = vector.multi_reduction <add>, %159, %cst_72 [1] : vector<8x32xf32> to vector<8xf32>
    %161 = vector.shape_cast %160 : vector<8xf32> to vector<8x1xf32>
    %cst_73 = arith.constant 3.200000e+01 : f32
    %162 = vector.broadcast %cst_73 : f32 to vector<8x1xf32>
    %163 = arith.divf %161, %162 : vector<8x1xf32>
    %164 = vector.broadcast %156 : vector<8x1xf32> to vector<8x32xf32>
    %165 = arith.subf %152, %164 : vector<8x32xf32>
    %cst_74 = arith.constant 9.99999974E-6 : f32
    %166 = vector.broadcast %cst_74 : f32 to vector<8x1xf32>
    %167 = arith.addf %163, %166 : vector<8x1xf32>
    %168 = math.rsqrt %167 : vector<8x1xf32>
    %169 = vector.broadcast %168 : vector<8x1xf32> to vector<8x32xf32>
    %170 = arith.mulf %165, %169 : vector<8x32xf32>
    %171 = vector.broadcast %113 : vector<1x32xf32> to vector<8x32xf32>
    %172 = arith.mulf %170, %171 : vector<8x32xf32>
    %173 = vector.broadcast %114 : vector<1x32xf32> to vector<8x32xf32>
    %174 = arith.addf %172, %173 : vector<8x32xf32>
    %c0_75 = arith.constant 0 : index
    %c0_76 = arith.constant 0 : index
    %c0_77 = arith.constant 0 : index
    %175 = vector.load %arg16[%c0_75, %c0_76, %c0_77] : memref<1x8x32xf32, #tpu.memory_space<vmem>>, vector<1x8x32xf32>
    %176 = vector.shape_cast %175 : vector<1x8x32xf32> to vector<8x32xf32>
    %177 = vector.shape_cast %174 : vector<8x32xf32> to vector<1x8x32xf32>
    tpu.vector_store %arg16[%c0_75, %c0_76, %c0_77], %177 {strides = array<i32>} : memref<1x8x32xf32, #tpu.memory_space<vmem>>, vector<1x8x32xf32>,
    return
  }
  func.func @transform_0(%arg0: i32, %arg1: i32) -> (i32, i32, i32) {
    %c0_i32 = arith.constant 0 : i32
    %c0_i32_0 = arith.constant 0 : i32
    return %arg0, %arg1, %c0_i32 : i32, i32, i32
  }
  func.func @transform_1(%arg0: i32, %arg1: i32) -> (i32, i32, i32) {
    %c0_i32 = arith.constant 0 : i32
    %c0_i32_0 = arith.constant 0 : i32
    %c0_i32_1 = arith.constant 0 : i32
    return %arg0, %c0_i32, %c0_i32_0 : i32, i32, i32
  }
  func.func @transform_2(%arg0: i32, %arg1: i32) -> (i32, i32) {
    %c0_i32 = arith.constant 0 : i32
    %c0_i32_0 = arith.constant 0 : i32
    %c0_i32_1 = arith.constant 0 : i32
    return %c0_i32, %c0_i32_0 : i32, i32
  }
  func.func @transform_3(%arg0: i32, %arg1: i32) -> (i32, i32) {
    %c0_i32 = arith.constant 0 : i32
    %c0_i32_0 = arith.constant 0 : i32
    %c0_i32_1 = arith.constant 0 : i32
    return %c0_i32, %c0_i32_0 : i32, i32
  }
  func.func @transform_4(%arg0: i32, %arg1: i32) -> (i32, i32) {
    %c0_i32 = arith.constant 0 : i32
    %c0_i32_0 = arith.constant 0 : i32
    %c0_i32_1 = arith.constant 0 : i32
    return %c0_i32, %c0_i32_0 : i32, i32
  }
  func.func @transform_5(%arg0: i32, %arg1: i32) -> (i32, i32) {
    %c0_i32 = arith.constant 0 : i32
    %c0_i32_0 = arith.constant 0 : i32
    %c0_i32_1 = arith.constant 0 : i32
    return %c0_i32, %c0_i32_0 : i32, i32
  }
  func.func @transform_6(%arg0: i32, %arg1: i32) -> (i32, i32) {
    %c0_i32 = arith.constant 0 : i32
    %c0_i32_0 = arith.constant 0 : i32
    %c0_i32_1 = arith.constant 0 : i32
    return %c0_i32, %c0_i32_0 : i32, i32
  }
  func.func @transform_7(%arg0: i32, %arg1: i32) -> (i32, i32) {
    %c0_i32 = arith.constant 0 : i32
    %c0_i32_0 = arith.constant 0 : i32
    %c0_i32_1 = arith.constant 0 : i32
    return %c0_i32, %c0_i32_0 : i32, i32
  }
  func.func @transform_8(%arg0: i32, %arg1: i32) -> (i32, i32) {
    %c0_i32 = arith.constant 0 : i32
    %c0_i32_0 = arith.constant 0 : i32
    %c0_i32_1 = arith.constant 0 : i32
    return %c0_i32, %c0_i32_0 : i32, i32
  }
  func.func @transform_9(%arg0: i32, %arg1: i32) -> (i32, i32) {
    %c0_i32 = arith.constant 0 : i32
    %c0_i32_0 = arith.constant 0 : i32
    %c0_i32_1 = arith.constant 0 : i32
    return %c0_i32, %c0_i32_0 : i32, i32
  }
  func.func @transform_10(%arg0: i32, %arg1: i32) -> (i32, i32) {
    %c0_i32 = arith.constant 0 : i32
    %c0_i32_0 = arith.constant 0 : i32
    %c0_i32_1 = arith.constant 0 : i32
    return %c0_i32, %c0_i32_0 : i32, i32
  }
  func.func @transform_11(%arg0: i32, %arg1: i32) -> (i32, i32) {
    %c0_i32 = arith.constant 0 : i32
    %c0_i32_0 = arith.constant 0 : i32
    %c0_i32_1 = arith.constant 0 : i32
    return %c0_i32, %c0_i32_0 : i32, i32
  }
  func.func @transform_12(%arg0: i32, %arg1: i32) -> (i32, i32) {
    %c0_i32 = arith.constant 0 : i32
    %c0_i32_0 = arith.constant 0 : i32
    %c0_i32_1 = arith.constant 0 : i32
    return %c0_i32, %c0_i32_0 : i32, i32
  }
  func.func @transform_13(%arg0: i32, %arg1: i32) -> (i32, i32) {
    %c0_i32 = arith.constant 0 : i32
    %c0_i32_0 = arith.constant 0 : i32
    %c0_i32_1 = arith.constant 0 : i32
    return %c0_i32, %c0_i32_0 : i32, i32
  }
  func.func @transform_14(%arg0: i32, %arg1: i32) -> (i32, i32, i32) {
    %c0_i32 = arith.constant 0 : i32
    %c0_i32_0 = arith.constant 0 : i32
    return %arg0, %arg1, %c0_i32 : i32, i32, i32
  }
  func.func @transform_15(%arg0: i32, %arg1: i32) -> (i32, i32, i32, i32) {
    %c0_i32 = arith.constant 0 : i32
    %c0_i32_0 = arith.constant 0 : i32
    %c0_i32_1 = arith.constant 0 : i32
    return %arg0, %c0_i32, %arg1, %c0_i32_0 : i32, i32, i32, i32
  }
}

</mosaic_0001>

<bundles_post_ra>
// kernel: tpu_custom_call.1
= control target key start
LH: loop header
LB: loop body
LE: loop exit
PB: predicated region body
PF: predicated region fallthrough
CT: control target
= control target key end

     0   :  { %s2681_s0 = inlined_call_operand.vmem [shape: f32[2,8,32], index: 0, kind: input, shape index: {}]   ;;  %s2682_s1 = inlined_call_operand.vmem [shape: f32[2,8,32], index: 1, kind: input, shape index: {}]   ;;  %s2683_s2 = inlined_call_operand.vmem [shape: bf16[32,32], index: 2, kind: input, shape index: {}]   ;;  %s2684_s3 = inlined_call_operand.vmem [shape: bf16[32,64], index: 3, kind: input, shape index: {}]   ;;  %s2685_s4 = inlined_call_operand.vmem [shape: bf16[32,32], index: 4, kind: input, shape index: {}]   ;;  %s2686_s5 = inlined_call_operand.vmem [shape: f32[1,32], index: 5, kind: input, shape index: {}]   ;;  %s2687_s6 = inlined_call_operand.vmem [shape: f32[1,64], index: 6, kind: input, shape index: {}]   ;;  %s2688_s7 = inlined_call_operand.hbm [shape: f32[1,32], index: 7, kind: input, shape index: {}]   ;;  %s2689_s8 = inlined_call_operand.hbm [shape: bf16[32,128], index: 8, kind: input, shape index: {}]   ;;  %s2690_s9 = inlined_call_operand.hbm [shape: f32[1,128], index: 9, kind: input, shape index: {}]   ;;  %s2691_s10 = inlined_call_operand.vmem [shape: bf16[128,32], index: 10, kind: input, shape index: {}]   ;;  %s2692_s11 = inlined_call_operand.vmem [shape: f32[1,32], index: 11, kind: input, shape index: {}]   ;;  %s2693_s12 = inlined_call_operand.vmem [shape: f32[1,32], index: 12, kind: input, shape index: {}]   ;;  %s2694_s13 = inlined_call_operand.vmem [shape: f32[1,32], index: 13, kind: input, shape index: {}]   ;;  %s2695_s14 = inlined_call_operand.hbm [shape: f32[2,8,32], index: 14, kind: output, shape index: {0}]   ;;  %s2696_s15 = inlined_call_operand.hbm [shape: f32[2,4,8,8], index: 15, kind: output, shape index: {1}]  }
   0x1   :  { %2705 = sst [smem:[#allocation22_spill]] %s2695_s14 }
   0x2   :  { %21 = vsyncpa [#allocation3], 0 }
   0x3   :  { %22 = vsyncpa [#allocation6], 0 }
   0x4   :  { %23 = vsyncpa [#allocation4], 0 }
   0x5   :  { %25 = vsyncpa [#allocation4 + $0x1], 0 }
   0x6   :  { %26 = vsyncpa [#allocation10], 0 }
   0x7   :  { %28 = vsyncpa [#allocation10 + $0x1], 0  ;;  %s2314_s18 = smov 0   ;;  %s2316_s19 = smov 0  }
   0x8   :  { %s2318_s20 = smov 0   ;;  %s2320_s21 = smov 0  }
   0x9   :  { %s2322_s22 = smov 0   ;;  %s2324_s23 = smov 0  }
   0xa LB: > { %2706 = sst [smem:[#allocation15_spill]] %s2191_s18  ;;  %s1678_s24 = sadd.s32 4294967295, %s2211_s23   ;;  %s2211_s23 = sphi %s2324_s23, %s34_s23   ;;  %s2207_s22 = sphi %s2322_s22, %s2726_s22   ;;  %s2203_s21 = sphi %s2320_s21, %s2725_s21   ;;  %s2199_s20 = sphi %s2318_s20, %s2724_s20   ;;  %s2195_s19 = sphi %s2316_s19, %s2728_s19   ;;  %s2191_s18 = sphi %s2314_s18, %s2727_s18  }
   0xb   : > { %2707 = sst [smem:[#allocation16_spill]] %s2199_s20  ;;  %s1679_s25 = sadd.s32 4294967294, %s2211_s23  }
   0xc   : > { %2708 = sst [smem:[#allocation17_spill]] %s2207_s22  ;;  %s46_s26 = sadd.s32 1, %s2207_s22 }
   0xd   : > { %2709 = sst [smem:[#allocation18_spill]] %s2211_s23  ;;  %s361_s27 = sadd.s32 1, %s2199_s20 }
   0xe   : > { %p48_p0 = scmp.ge.s32.totalorder %s46_s26, 2  ;;  %p371_p1 = scmp.ne.s32.totalorder %s2199_s20, %s2195_s19 }
   0xf   : > { %p372_p2 = scmp.eq.s32.totalorder %s1678_s24, 1  ;;  %p377_p3 = scmp.ne.s32.totalorder %s2195_s19, %s2191_s18 }
  0x10   : > { %s2730_s26 = smov (%p48_p0, %s46_s26), 0  ;;  %p378_p5 = scmp.eq.s32.totalorder %s1679_s25, 1 }
  0x11   : > { %2710 = sst [smem:[#allocation19_spill]] %s2730_s26  ;;  %p2354_p4 = por %p372_p2, %p371_p1 }
  0x12   : > { %s356_s29 = ssub.s32 %s2207_s22, %s2730_s26  ;;  %p1680_p6 = scmp.ge.s32.totalorder %s2211_s23, 1 }
  0x13   : > { %p359_p7 = scmp.eq.s32.totalorder %s356_s29, 0  ;;  %p2361_p8 = por %p378_p5, %p377_p3 }
  0x14   : > { %p413_p9 = scmp.lt.s32.totalorder %s2211_s23, 3  ;;  %p2373_p11 = scmp.eq.s32.totalorder %s1678_s24, 0 }
  0x15   : > { %s2712_s30 = scalar_select %p2361_p8, 1, 0 }
  0x16   : > { %s2367_s16 = scalar_select %p359_p7, %s2199_s20, %s361_s27  }
  0x17   : > { %2713 = sst [smem:[#allocation20_spill]] %s2712_s30  ;;  %p2369_p10 = pnand %p1680_p6, %p413_p9 }
  0x18   : > { %2714 = sst [smem:[#allocation21_spill]] %s2367_s16  ;;  %s2213_s25 = smov [#allocation5]  }
  0x19   : > { %p1892_p12 = pneg %p2369_p10  ;;  %s451_s29 = sshll.u32 %s2213_s25, 4  ;;  %s452_s29 = int_to_ptr.vmem [resolvable:$true] %s451_s29 }
  0x1a   : > { %s2214_s27 = smov [#allocation2]   ;;  %s2030_s24 = scalar_lea.vmem %s452_s29, 256 }
  0x1b   : > { %p2381_p13 = pnand %p2373_p11, %p1892_p12  ;;  %s441_s22 = sshll.u32 %s2214_s27, 4  ;;  %s442_s22 = int_to_ptr.vmem [resolvable:$true] %s441_s22 }
  0x1c   : > { %p2031_p1 = scmp.ne.s32.totalorder %s452_s29, %s2030_s24  ;;  %p2038_p5 = scmp.lt.s32.totalorder %s452_s29, %s452_s29 }
  0x1d   : > { %p2021_p0 = pneg %p2381_p13  ;;  %p2039_p6 = scmp.lt.s32.totalorder %s2030_s24, %s2030_s24 }
  0x1f   : > { %p2033_p2 = pnand %p2031_p1, %p2021_p0  ;;  %p2040_p7 = por %p2039_p6, %p2038_p5 }
  0x21   : > { %p2034_p3 = pneg %p2033_p2 }
  0x23   : > { %p2041_p9 = pnand %p2040_p7, %p2034_p3 }
  0x25   : > { %2044 = shalt.err (!%p2041_p9)
}
  0x26   : > { %s2215_s25 = smov 64   ;;  %s2216_s16 = smov 4  }
  0x27   : > { %1898 = dma.hbm_to_vmem [thread:$0]  (!%p2381_p13), %s2689_s8, 256, %s452_s29, [#allocation6], %s2215_s25, %s2215_s25, %s2216_s16  }
  0x28   : > { %s2056_s30 = scalar_lea.vmem %s442_s22, 16  ;;  %s2063_s24 = scalar_lea.vmem %s442_s22, 32 }
  0x29   : > { %p2057_p12 = scmp.ne.s32.totalorder %s442_s22, %s2056_s30  ;;  %p2064_p5 = scmp.lt.s32.totalorder %s442_s22, %s442_s22 }
  0x2a   : > { %p2065_p3 = scmp.lt.s32.totalorder %s2063_s24, %s2056_s30 }
  0x2b   : > { %p2059_p1 = pnand %p2057_p12, %p2021_p0 }
  0x2c   : > { %p2066_p6 = por %p2065_p3, %p2064_p5 }
  0x2d   : > { %p2060_p2 = pneg %p2059_p1 }
  0x2f   : > { %p2067_p7 = pnand %p2066_p6, %p2060_p2 }
  0x31   : > { %2070 = shalt.err (!%p2067_p7)
}
  0x32   : > { %1895 = dma.hbm_to_vmem [thread:$0]  (!%p2381_p13), %s2688_s7, 16, %s442_s22, [#allocation3]  }
  0x33   : > { %s2217_s20 = smov [#allocation7]  }
  0x34   : > { %s465_s16 = sshll.u32 %s2217_s20, 4  ;;  %s466_s16 = int_to_ptr.vmem [resolvable:$true] %s465_s16 }
  0x35   : > { %s2082_s29 = scalar_lea.vmem %s466_s16, 16  ;;  %s2089_s30 = scalar_lea.vmem %s466_s16, 32 }
  0x36   : > { %p2083_p9 = scmp.ne.s32.totalorder %s466_s16, %s2082_s29  ;;  %p2090_p5 = scmp.lt.s32.totalorder %s466_s16, %s466_s16 }
  0x37   : > { %p2091_p2 = scmp.lt.s32.totalorder %s2089_s30, %s2082_s29 }
  0x38   : > { %p2085_p12 = pnand %p2083_p9, %p2021_p0 }
  0x39   : > { %p2092_p3 = por %p2091_p2, %p2090_p5 }
  0x3a   : > { %p2086_p1 = pneg %p2085_p12 }
  0x3c   : > { %p2093_p6 = pnand %p2092_p3, %p2086_p1 }
  0x3e   : > { %2096 = shalt.err (!%p2093_p6)
}
  0x3f   : > { %1901 = dma.hbm_to_vmem [thread:$0]  (!%p2381_p13), %s2690_s9, 16, %s466_s16, [#allocation6]  }
  0x40   : > { %507 = sbr.rel (%p2369_p10) target bundleno = 2476 (0x9ac), region = 76 }
  0x45   : > { %2174 = dma.done.wait (%p2373_p11), [#allocation3], 16  }
  0x46   : > { %2176 = vsyncadd (%p2373_p11), [#allocation3], 4294967280 }
  0x47   : > { %2178 = dma.done.wait (%p2373_p11), [#allocation6], 272  }
  0x48   : > { %2180 = vsyncadd (%p2373_p11), [#allocation6], 4294967024  ;;  %p574_p0 = scmp.lt.s32.totalorder %s2203_s21, 1  ;;  %v2218_v0 = vmov 0.0   ;;  %vm2219_vm0 = vmmov 0   ;;  %v1983_v1 = vld [vmem:[%s2683_s2 + $0x8] sm:$0xff]   ;;  %v726_v33 = vlaneseq }
  0x49   : > { %1776 = vmatprep.subr.bf16.mxu1 %v2218_v0  ;;  %1780 = vmatprep.mubr.msk.bf16.mxu1 %vm2219_vm0, %v2218_v0  ;;  %v1984_v2 = vld [vmem:[%s2683_s2] sm:$0xff]   ;;  %vm614_vm1 = vcmask 261120   ;;  %v1985_v4 = vld [vmem:[%s2684_s3 + $0x8] sm:$0xff]   ;;  %vm734_vm2 = vcmask 64512   ;;  %s2220_s20 = smov 112   ;;  %s2221_s16 = smov 120  }
  0x4a   : > { %s575_s22 = scalar_select %p574_p0, %s2203_s21, 1  ;;  %1804 = vmatprep.subr.bf16.mxu0 %v2218_v0  ;;  %1806 = vmatprep.mubr.msk.bf16.mxu0 %vm2219_vm0, %v2218_v0  ;;  %v1986_v6 = vld [vmem:[%s2684_s3] sm:$0xff]   ;;  %v727_v34 = vshrl.u32 %v726_v33, 7  ;;  %v731_v35 = vand.u32 127, %v726_v33  ;;  %v2223_v36 = vmov -1e+30  }
  0x4b   : > { %1777 = vmatpush3.bf16.msra.mxu1 %v1983_v1  ;;  %v1697_v13 = vld [vmem:[%s2687_s6] ss:$0 sm:$0xff]  ;;  %s2222_s29 = smov 104   ;;  %s2224_s30 = smov 96   ;;  %vm800_vm4 = vcmask 1043456   ;;  %vm1194_vm5 = vcmask 130048  }
  0x4c   : > { %s1691_s26 = sshll.u32 %s575_s22, 3  ;;  %1778 = vmatprep.subr.bf16.mxu1 %v2218_v0  ;;  %v1693_v14 = vld [vmem:[%s2686_s5] ss:$0 sm:$0xff]  ;;  %vm732_vm3 = vcmp.ge.s32.totalorder %v727_v34, %v731_v35  ;;  %s2225_s14 = smov 80   ;;  %vm1196_vm6 = vcmask 195584  }
  0x4d   : > { %s580_s25 = scalar_lea.vmem %s2681_s0, %s1691_s26  ;;  %s584_s22 = scalar_lea.vmem %s2682_s1, %s1691_s26  ;;  %v733_v37 = vsel %vm732_vm3, 0.0, %v2223_v36 }
  0x4e   : > { %v2438_v3 = vld [vmem:[%s580_s25] sm:$0xff]  ;;  %s2226_s23 = smov 72   ;;  %s2227_s18 = smov 88  }
  0x4f   : > { %v590_v5 = vpack.c.bf16 %v2438_v3, %v2438_v3  ;;  %1779 = vmatpush3.bf16.msra.mxu1 %v1984_v2  ;;  %v588_v7 = vld [vmem:[%s584_s22] sm:$0xff]  ;;  %s2507_s22 = sand.u32 1, %s2195_s19   ;;  %s2228_s24 = smov 8  }
  0x50   : > { %1784 = vmatprep.subr.bf16.mxu1 %v2218_v0  ;;  %v589_v8 = vpack.c.bf16 %v588_v7, %v588_v7  ;;  %s1690_s17 = sshll.u32 %s2507_s22, 5 }
  0x51   : > { %s2511_s26 = scalar_lea.vmem [#allocation9], %s1690_s17 }
  0x52   : > { %1781 = vmatmul.mubr.msk.bf16.vlgmr.msra.gmra.mxu1 %vm614_vm1, %v590_v5  ;;  %s1527_s17 = sshll.u32 %s2511_s26, 4  ;;  %s2607_s17 = int_to_ptr.vmem [resolvable:$true] %s1527_s17 }
  0x53   : > { %1785 = vmatpush3.bf16.msra.mxu1 %v1985_v4  ;;  %1788 = vmatprep.mubr.msk.bf16.mxu1 %vm2219_vm0, %v2218_v0 }
  0x54   : > { %1786 = vmatprep.subr.bf16.mxu1 %v2218_v0 }
  0x57   : > { %1787 = vmatpush3.bf16.msra.mxu1 %v1986_v6 }
  0x58   : > { %1792 = vmatprep.subr.bf16.mxu1 %v2218_v0 }
  0x5a   : > { %1789 = vmatmul.mubr.msk.bf16.vlgmr.msra.gmra.mxu1 %vm614_vm1, %v589_v8 }
  0x5b   : > { %1794 = vmatprep.mubr.msk.bf16.mxu1 %vm2219_vm0, %v2218_v0 }
 0x112   : > { %v652_v9 = vpop.f32.mrf.mxu1 }
 0x113   : > { %v653_v18 = vadd.f32 %v1693_v14, %v652_v9 }
 0x114   : > { %v1782_v10 = vpop.f32.mrf.mxu1 }
 0x115   : > { %v724_v23 = vpack.c.bf16 %v653_v18, %v653_v18 }
 0x116   : > { %v655_v11 = vpop.f32.mrf.mxu1 }
 0x118   : > { %v1783_v12 = vpop.f32.mrf.mxu1 }
 0x11a   : > { %v718_v15 = vpop.f32.mrf.mxu1 }
 0x11b   : > { %v719_v16 = vadd.f32 %v1697_v13, %v718_v15 }
 0x11c   : > { %v1790_v17 = vpop.f32.mrf.mxu1 }
 0x11d   : > { %v2467_v19 = vpack.c.bf16 %v719_v16, %v719_v16 }
 0x11e   : > { %v721_v20 = vpop.f32.mrf.mxu1 }
 0x11f   : > { %959 = vrot.lane.b32.xlu1 %v2467_v19, %s2220_s20  ;;  %847 = vrot.lane.b32.xlu0 %v2467_v19, %s2221_s16  ;;  %v739_v21 = vsel %vm734_vm2, %v2467_v19, 0 }
 0x120   : > { %v1791_v22 = vpop.f32.mrf.mxu1  ;;  %1793 = vmatpush3.bf16.xpose.msra.mxu1 %v739_v21 }
 0x121   : > { %1798 = vmatprep.subr.bf16.mxu1 %v2218_v0 }
 0x123   : > { %957 = vrot.lane.b32.xlu1 %v724_v23, %s2220_s20  ;;  %845 = vrot.lane.b32.xlu0 %v724_v23, %s2221_s16 }
 0x127   : > { %1069 = vrot.lane.b32.xlu1 %v724_v23, %s2222_s29  ;;  %1071 = vrot.lane.b32.xlu0 %v2467_v19, %s2222_s29  ;;  %s2229_s29 = smov 16  }
 0x128   : > { %1795 = vmatmul.mubr.msk.bf16.vlgmr.msra.gmra.mxu1 %vm734_vm2, %v724_v23 }
 0x129   : > { %1800 = vmatprep.mubr.msk.bf16.mxu1 %vm2219_vm0, %v2218_v0 }
 0x191   : > { %v848_v24 = vpop.permute.xlu0 %847  ;;  %v960_v26 = vpop.permute.xlu1 %959 }
 0x192   : > { %v853_v25 = vsel %vm734_vm2, %v848_v24, 0  ;;  %v965_v28 = vsel %vm734_vm2, %v960_v26, 0 }
 0x193   : > { %1805 = vmatpush3.bf16.xpose.msra.mxu0 %v853_v25 }
 0x194   : > { %1816 = vmatprep.subr.bf16.mxu0 %v2218_v0 }
 0x195   : > { %v846_v27 = vpop.permute.xlu0 %845  ;;  %v958_v30 = vpop.permute.xlu1 %957 }
 0x199   : > { %v1072_v29 = vpop.permute.xlu0 %1071  ;;  %v1070_v32 = vpop.permute.xlu1 %1069 }
 0x19a   : > { %1807 = vmatmul.mubr.msk.bf16.vlgmr.msra.gmra.mxu0 %vm734_vm2, %v846_v27  ;;  %v1077_v31 = vsel %vm734_vm2, %v1072_v29, 0 }
 0x19b   : > { %1817 = vmatpush3.bf16.xpose.msra.mxu0 %v965_v28  ;;  %1818 = vmatprep.mubr.msk.bf16.mxu0 %vm2219_vm0, %v2218_v0 }
 0x19c   : > { %1828 = vmatprep.subr.bf16.mxu0 %v2218_v0 }
 0x1a2   : > { %1819 = vmatmul.mubr.msk.bf16.vlgmr.msra.gmra.mxu0 %vm734_vm2, %v958_v30 }
 0x1a3   : > { %1829 = vmatpush3.bf16.xpose.msra.mxu0 %v1077_v31  ;;  %1830 = vmatprep.mubr.msk.bf16.mxu0 %vm2219_vm0, %v2218_v0 }
 0x1a4   : > { %1840 = vmatprep.subr.bf16.mxu0 %v2218_v0 }
 0x1aa   : > { %1831 = vmatmul.mubr.msk.bf16.vlgmr.msra.gmra.mxu0 %vm734_vm2, %v1070_v32 }
 0x1ab   : > { %1844 = vmatprep.mubr.msk.bf16.mxu0 %vm2219_vm0, %v2218_v0 }
 0x1e8   : > { %v775_v38 = vpop.f32.mrf.mxu1 }
 0x1e9   : > { %v776_v39 = vadd.f32 %v775_v38, %v733_v37 }
 0x1ea   : > { %v1796_v40 = vpop.f32.mrf.mxu1 }
 0x1eb   : > { %v781_v41 = vsel %vm734_vm2, %v776_v39, -inf }
 0x1ec   : > { %782 = vmax.xlane.f32.xlu0 %v781_v41  ;;  %v778_v42 = vpop.f32.mrf.mxu1 }
 0x1ee   : > { %v1797_v43 = vpop.f32.mrf.mxu1 }
 0x25a   : > { %v889_v44 = vpop.f32.mrf.mxu0 }
 0x25b   : > { %v890_v45 = vadd.f32 %v889_v44, %v733_v37 }
 0x25c   : > { %v1808_v46 = vpop.f32.mrf.mxu0 }
 0x25d   : > { %v895_v47 = vsel %vm734_vm2, %v890_v45, -inf }
 0x25e   : > { %896 = vmax.xlane.f32.xlu1 %v895_v47  ;;  %v892_v48 = vpop.f32.mrf.mxu0 }
 0x25f   : > { %v1987_v48 = vld [vmem:[%s2685_s4 + $0x8] sm:$0xff]  }
 0x260   : > { %v1809_v49 = vpop.f32.mrf.mxu0  ;;  %1841 = vmatpush3.bf16.msra.mxu0 %v1987_v48 }
 0x261   : > { %1842 = vmatprep.subr.bf16.mxu0 %v2218_v0 }
 0x262   : > { %v1001_v50 = vpop.f32.mrf.mxu0 }
 0x263   : > { %v1002_v51 = vadd.f32 %v1001_v50, %v733_v37 }
 0x264   : > { %v1820_v52 = vpop.f32.mrf.mxu0 }
 0x265   : > { %v1007_v53 = vsel %vm734_vm2, %v1002_v51, -inf }
 0x266   : > { %v1004_v54 = vpop.f32.mrf.mxu0  ;;  %1008 = vmax.xlane.f32.xlu0 %v1007_v53 }
 0x268   : > { %v1821_v55 = vpop.f32.mrf.mxu0 }
 0x26a   : > { %v1113_v56 = vpop.f32.mrf.mxu0 }
 0x26b   : > { %v1114_v57 = vadd.f32 %v1113_v56, %v733_v37 }
 0x26c   : > { %v1832_v58 = vpop.f32.mrf.mxu0 }
 0x26d   : > { %v1119_v59 = vsel %vm734_vm2, %v1114_v57, -inf }
 0x26e   : > { %v1116_v60 = vpop.f32.mrf.mxu0  ;;  %1120 = vmax.xlane.f32.xlu0 %v1119_v59 }
 0x270   : > { %v1833_v61 = vpop.f32.mrf.mxu0 }
 0x275   : > { %v783_v62 = vpop.xlane.xlu0 %782 }
 0x276   : > { %v784_v63 = vsub.f32 %v776_v39, %v783_v62 }
 0x278   : > { %v785_v1 = vmul.f32 1.442695, %v784_v63 }
 0x27a   : > { %1999 = vpow2.f32 %v785_v1 }
 0x287   : > { %v2000_v2 = vpop.eup %1999 }
 0x288   : > { %v787_v4 = vsel %vm734_vm2, %v2000_v2, 0.0 }
 0x289   : > { %788 = vadd.xlane.f32.xlu1 %v787_v4 }
 0x29a   : > { %795 = vrot.lane.b32.xlu1 %v2467_v19, %s2224_s30  ;;  %s2230_s30 = smov 24  }
 0x2e7   : > { %v897_v5 = vpop.xlane.xlu1 %896 }
 0x2e8   : > { %v898_v6 = vsub.f32 %v890_v45, %v897_v5 }
 0x2ea   : > { %v899_v7 = vmul.f32 1.442695, %v898_v6 }
 0x2ec   : > { %2001 = vpow2.f32 %v899_v7  ;;  %v1712_v7 = vld [vmem:[#allocation2] ss:$0 sm:$0xff] }
 0x2ef   : > { %v1009_v8 = vpop.xlane.xlu0 %1008 }
 0x2f0   : > { %v1010_v9 = vsub.f32 %v1002_v51, %v1009_v8  ;;  %v1988_v51 = vld [vmem:[%s2685_s4] sm:$0xff]  }
 0x2f1   : > { %1843 = vmatpush3.bf16.msra.mxu0 %v1988_v51 }
 0x2f2   : > { %v1011_v10 = vmul.f32 1.442695, %v1010_v9  ;;  %1856 = vmatprep.subr.bf16.mxu0 %v2218_v0 }
 0x2f4   : > { %2003 = vpow2.f32 %v1011_v10 }
 0x2f7   : > { %v1121_v11 = vpop.xlane.xlu0 %1120 }
 0x2f8   : > { %v1122_v12 = vsub.f32 %v1114_v57, %v1121_v11 }
 0x2f9   : > { %v2002_v13 = vpop.eup %2001 }
 0x2fa   : > { %v1123_v14 = vmul.f32 1.442695, %v1122_v12  ;;  %v901_v15 = vsel %vm734_vm2, %v2002_v13, 0.0 }
 0x2fb   : > { %902 = vadd.xlane.f32.xlu0 %v901_v15 }
 0x2fc   : > { %2005 = vpow2.f32 %v1123_v14 }
 0x301   : > { %v2004_v16 = vpop.eup %2003 }
 0x302   : > { %v1013_v17 = vsel %vm734_vm2, %v2004_v16, 0.0 }
 0x303   : > { %1014 = vadd.xlane.f32.xlu1 %v1013_v17 }
 0x309   : > { %v2006_v18 = vpop.eup %2005 }
 0x30a   : > { %v1125_v20 = vsel %vm734_vm2, %v2006_v18, 0.0 }
 0x30b   : > { %1126 = vadd.xlane.f32.xlu0 %v1125_v20 }
 0x312   : > { %v789_v21 = vpop.xlane.xlu1 %788 }
 0x313   : > { %2007 = vrcp.f32 %v789_v21  ;;  %v1989_v21 = vld [vmem:[#allocation5 + $0x8] sm:$0xff]  }
 0x314   : > { %1021 = vrot.lane.b32.xlu1 %v2467_v19, %s2225_s14 }
 0x316   : > { %v796_v22 = vpop.permute.xlu1 %795 }
 0x317   : > { %v802_v23 = vsel %vm800_vm4, %v796_v22, 0  ;;  %v1990_v22 = vld [vmem:[#allocation5] sm:$0xff]  }
 0x318   : > { %1799 = vmatpush3.bf16.msra.mxu1 %v802_v23  ;;  %1133 = vrot.lane.b32.xlu1 %v2467_v19, %s2226_s23  ;;  %v1992_v23 = vld [vmem:[%s2691_s10 + $0x30] sm:$0xff]  }
 0x319   : > { %1810 = vmatprep.subr.bf16.mxu1 %v2218_v0 }
 0x320   : > { %v2008_v24 = vpop.eup %2007 }
 0x321   : > { %909 = vrot.lane.b32.xlu0 %v2467_v19, %s2227_s18  ;;  %v791_v25 = vmul.f32 %v2008_v24, %v2000_v2  ;;  %v1993_v24 = vld [vmem:[%s2691_s10 + $0x28] sm:$0xff]   ;;  %s1738_s18 = sshll.u32 %s2203_s21, 9 }
 0x322   : > { %s2612_s20 = scalar_lea.hbm %s2696_s15, %s1738_s18 }
 0x323   : > { %v793_v26 = vpack.c.bf16 %v791_v25, %v791_v25  ;;  %792 = vst.msk [vmem:[%s2511_s26] sm:$0xff] %vm734_vm2, %v791_v25  ;;  %v1994_v25 = vld [vmem:[%s2691_s10 + $0x20] sm:$0xff]  }
 0x325   : > { %1801 = vmatmul.mubr.msk.bf16.vlgmr.msra.gmra.mxu1 %vm734_vm2, %v793_v26  ;;  %v1995_v26 = vld [vmem:[%s2691_s10 + $0x18] sm:$0xff]  }
 0x326   : > { %1812 = vmatprep.mubr.msk.bf16.mxu1 %vm2219_vm0, %v2218_v0 }
 0x384   : > { %v903_v27 = vpop.xlane.xlu0 %902 }
 0x385   : > { %2009 = vrcp.f32 %v903_v27  ;;  %v1996_v27 = vld [vmem:[%s2691_s10 + $0x10] sm:$0xff]  }
 0x38c   : > { %v1015_v28 = vpop.xlane.xlu1 %1014 }
 0x38d   : > { %2011 = vrcp.f32 %v1015_v28 }
 0x390   : > { %v1022_v34 = vpop.permute.xlu1 %1021 }
 0x391   : > { %v1027_v37 = vsel %vm800_vm4, %v1022_v34, 0 }
 0x392   : > { %v2010_v29 = vpop.eup %2009 }
 0x393   : > { %v905_v19 = vmul.f32 %v2010_v29, %v2002_v13 }
 0x394   : > { %v1127_v30 = vpop.xlane.xlu0 %1126  ;;  %v1134_v39 = vpop.permute.xlu1 %1133 }
 0x395   : > { %2013 = vrcp.f32 %v1127_v30  ;;  %1704 = vst.msk [vmem:[%s2511_s26 + $0x8] sm:$0xff] %vm734_vm2, %v905_v19  ;;  %v908_v35 = vpack.c.bf16 %v905_v19, %v905_v19  ;;  %v1139_v42 = vsel %vm800_vm4, %v1134_v39, 0  ;;  %v1718_v39 = vld [vmem:[#allocation7] ss:$0 sm:$0xff] }
 0x398   : > { %v910_v31 = vpop.permute.xlu0 %909 }
 0x399   : > { %v915_v32 = vsel %vm800_vm4, %v910_v31, 0  ;;  %v2583_v31 = vld [vmem:[%s2693_s12] ss:$0 sm:$0xff] }
 0x39a   : > { %v2012_v33 = vpop.eup %2011  ;;  %1811 = vmatpush3.bf16.msra.mxu1 %v915_v32 }
 0x39b   : > { %1822 = vmatprep.subr.bf16.mxu1 %v2218_v0  ;;  %v1017_v36 = vmul.f32 %v2012_v33, %v2004_v16  ;;  %v2588_v33 = vld [vmem:[%s2694_s13] ss:$0 sm:$0xff] }
 0x39d   : > { %1813 = vmatmul.mubr.msk.bf16.vlgmr.msra.gmra.mxu1 %vm734_vm2, %v908_v35  ;;  %1707 = vst.msk [vmem:[%s2511_s26 + $0x10] sm:$0xff] %vm734_vm2, %v1017_v36  ;;  %v1020_v40 = vpack.c.bf16 %v1017_v36, %v1017_v36 }
 0x39e   : > { %1823 = vmatpush3.bf16.msra.mxu1 %v1027_v37  ;;  %1824 = vmatprep.mubr.msk.bf16.mxu1 %vm2219_vm0, %v2218_v0  ;;  %v1997_v37 = vld [vmem:[%s2691_s10 + $0x8] sm:$0xff]  }
 0x39f   : > { %1834 = vmatprep.subr.bf16.mxu1 %v2218_v0 }
 0x3a2   : > { %v2014_v38 = vpop.eup %2013 }
 0x3a3   : > { %v1129_v41 = vmul.f32 %v2014_v38, %v2006_v18  ;;  %v1998_v38 = vld [vmem:[%s2691_s10] sm:$0xff]  }
 0x3a5   : > { %1825 = vmatmul.mubr.msk.bf16.vlgmr.msra.gmra.mxu1 %vm734_vm2, %v1020_v40  ;;  %1710 = vst.msk [vmem:[%s2511_s26 + $0x18] sm:$0xff] %vm734_vm2, %v1129_v41  ;;  %v1132_v43 = vpack.c.bf16 %v1129_v41, %v1129_v41 }
 0x3a6   : > { %1835 = vmatpush3.bf16.msra.mxu1 %v1139_v42  ;;  %1836 = vmatprep.mubr.msk.bf16.mxu1 %vm2219_vm0, %v2218_v0 }
 0x3a7   : > { %1848 = vmatprep.subr.bf16.mxu1 %v2218_v0 }
 0x3ad   : > { %1837 = vmatmul.mubr.msk.bf16.vlgmr.msra.gmra.mxu1 %vm734_vm2, %v1132_v43 }
 0x3ae   : > { %1852 = vmatprep.mubr.msk.bf16.mxu1 %vm2219_vm0, %v2218_v0  ;;  %1849 = vmatpush3.bf16.msra.mxu1 %v1989_v21 }
 0x3af   : > { %1850 = vmatprep.subr.bf16.mxu1 %v2218_v0 }
 0x3b2   : > { %1851 = vmatpush3.bf16.msra.mxu1 %v1990_v22 }
 0x3e5   : > { %v838_v44 = vpop.f32.mrf.mxu1 }
 0x3e7   : > { %v1802_v45 = vpop.f32.mrf.mxu1 }
 0x3e9   : > { %v841_v46 = vpop.f32.mrf.mxu1 }
 0x3eb   : > { %v1803_v47 = vpop.f32.mrf.mxu1 }
 0x3ec   : > { %v1722_v47 = vld [vmem:[%s2692_s11] ss:$0 sm:$0xff] }
 0x45d   : > { %v951_v49 = vpop.f32.mrf.mxu1 }
 0x45e   : > { %1182 = vrot.lane.b32.xlu0 %v951_v49, %s2228_s24 }
 0x45f   : > { %v1814_v50 = vpop.f32.mrf.mxu1 }
 0x461   : > { %v954_v52 = vpop.f32.mrf.mxu1 }
 0x463   : > { %v1815_v53 = vpop.f32.mrf.mxu1 }
 0x465   : > { %v1063_v54 = vpop.f32.mrf.mxu1 }
 0x466   : > { %1186 = vrot.lane.b32.xlu1 %v1063_v54, %s2229_s29  ;;  %s2097_s29 = scalar_lea.vmem %s2607_s17, 512 }
 0x467   : > { %v1826_v55 = vpop.f32.mrf.mxu1  ;;  %p2098_p10 = scmp.ne.s32.totalorder %s2607_s17, %s2097_s29 }
 0x469   : > { %v1066_v56 = vpop.f32.mrf.mxu1  ;;  %p2099_p11 = pnand %p2098_p10, %p2354_p4 }
 0x46b   : > { %v1827_v57 = vpop.f32.mrf.mxu1  ;;  %p2100_p13 = pneg %p2099_p11 }
 0x46d   : > { %v1175_v58 = vpop.f32.mrf.mxu1 }
 0x46e   : > { %1190 = vrot.lane.b32.xlu0 %v1175_v58, %s2230_s30  ;;  %s2231_s30 = smov [#allocation9]  }
 0x46f   : > { %v1838_v59 = vpop.f32.mrf.mxu1  ;;  %s2101_s14 = sshll.u32 %s2231_s30, 4  ;;  %s2102_s14 = int_to_ptr.vmem [resolvable:$false] %s2101_s14 }
 0x470   : > { %s2103_s26 = scalar_lea.vmem %s2102_s14, 1024  ;;  %p2104_p7 = scmp.lt.s32.totalorder %s2607_s17, %s2102_s14 }
 0x471   : > { %v1178_v60 = vpop.f32.mrf.mxu1  ;;  %p2105_p9 = scmp.lt.s32.totalorder %s2103_s26, %s2097_s29 }
 0x473   : > { %v1839_v61 = vpop.f32.mrf.mxu1  ;;  %p2106_p12 = por %p2105_p9, %p2104_p7 }
 0x475   : > { %p2107_p1 = pnand %p2106_p12, %p2100_p13 }
 0x4d0   : > { %v1183_v62 = vpop.permute.xlu0 %1182 }
 0x4d1   : > { %v1193_v1 = vsel %vm734_vm2, %v838_v44, %v1183_v62 }
 0x4d8   : > { %v1187_v63 = vpop.permute.xlu1 %1186 }
 0x4d9   : > { %v1195_v2 = vsel %vm1194_vm5, %v1193_v1, %v1187_v63 }
 0x4e0   : > { %v1191_v4 = vpop.permute.xlu0 %1190 }
 0x4e1   : > { %v1197_v5 = vsel %vm1196_vm6, %v1195_v2, %v1191_v4 }
 0x4e2   : > { %v1198_v6 = vpack.c.bf16 %v1197_v5, %v1197_v5 }
 0x4e4   : > { %1845 = vmatmul.mubr.msk.bf16.vlgmr.msra.gmra.mxu0 %vm614_vm1, %v1198_v6 }
 0x4e5   : > { %1872 = vmatprep.mubr.msk.bf16.mxu0 %vm2219_vm0, %v2218_v0 }
 0x5a4   : > { %v1259_v8 = vpop.f32.mrf.mxu0 }
 0x5a5   : > { %v1260_v9 = vadd.f32 %v1712_v7, %v1259_v8 }
 0x5a6   : > { %v1846_v10 = vpop.f32.mrf.mxu0 }
 0x5a7   : > { %v1267_v11 = vadd.f32 %v1260_v9, %v2438_v3  ;;  %v1991_v3 = vld [vmem:[%s2691_s10 + $0x38] sm:$0xff]  }
 0x5a8   : > { %v1262_v12 = vpop.f32.mrf.mxu0  ;;  %1857 = vmatpush3.bf16.msra.mxu0 %v1991_v3 }
 0x5a9   : > { %v1268_v13 = vsel %vm614_vm1, %v1267_v11, 0.0  ;;  %1858 = vmatprep.subr.bf16.mxu0 %v2218_v0 }
 0x5aa   : > { %1269 = vadd.xlane.f32.xlu1 %v1268_v13  ;;  %v1847_v14 = vpop.f32.mrf.mxu0 }
 0x5ac   : > { %1859 = vmatpush3.bf16.msra.mxu0 %v1992_v23 }
 0x5ad   : > { %1860 = vmatprep.subr.bf16.mxu0 %v2218_v0 }
 0x5b0   : > { %1861 = vmatpush3.bf16.msra.mxu0 %v1993_v24 }
 0x5b1   : > { %1862 = vmatprep.subr.bf16.mxu0 %v2218_v0 }
 0x5b4   : > { %1863 = vmatpush3.bf16.msra.mxu0 %v1994_v25 }
 0x5b5   : > { %1864 = vmatprep.subr.bf16.mxu0 %v2218_v0 }
 0x5b8   : > { %1865 = vmatpush3.bf16.msra.mxu0 %v1995_v26 }
 0x5b9   : > { %1866 = vmatprep.subr.bf16.mxu0 %v2218_v0 }
 0x5bc   : > { %1867 = vmatpush3.bf16.msra.mxu0 %v1996_v27 }
 0x5bd   : > { %1868 = vmatprep.subr.bf16.mxu0 %v2218_v0 }
 0x5c0   : > { %1869 = vmatpush3.bf16.msra.mxu0 %v1997_v37 }
 0x5c1   : > { %1870 = vmatprep.subr.bf16.mxu0 %v2218_v0 }
 0x5c4   : > { %1871 = vmatpush3.bf16.msra.mxu0 %v1998_v38 }
 0x633   : > { %v1270_v15 = vpop.xlane.xlu1 %1269 }
 0x634   : > { %v1272_v16 = vmul.f32 0.03125, %v1270_v15 }
 0x636   : > { %v1273_v17 = vsub.f32 %v1267_v11, %v1272_v16 }
 0x638   : > { %v1274_v18 = vmul.f32 %v1273_v17, %v1273_v17 }
 0x63a   : > { %v1275_v20 = vsel %vm614_vm1, %v1274_v18, 0.0 }
 0x63b   : > { %1276 = vadd.xlane.f32.xlu0 %v1275_v20 }
 0x6c4   : > { %v1277_v28 = vpop.xlane.xlu0 %1276 }
 0x6c5   : > { %v1278_v29 = vmul.f32 0.03125, %v1277_v28 }
 0x6c7   : > { %v1279_v19 = vadd.f32 1e-05, %v1278_v29 }
 0x6c9   : > { %2015 = vrsqrt.f32 %v1279_v19 }
 0x6d6   : > { %v2016_v30 = vpop.eup %2015 }
 0x6d7   : > { %v1281_v32 = vmul.f32 %v2016_v30, %v1273_v17 }
 0x6d9   : > { %v1288_v34 = vmul.f32 %v2583_v31, %v1281_v32 }
 0x6db   : > { %v1295_v35 = vadd.f32 %v2588_v33, %v1288_v34 }
 0x6dd   : > { %v1296_v36 = vpack.c.bf16 %v1295_v35, %v1295_v35 }
 0x6df   : > { %1853 = vmatmul.mubr.msk.bf16.vlgmr.msra.gmra.mxu1 %vm614_vm1, %v1296_v36 }
 0x79f   : > { %v1357_v40 = vpop.f32.mrf.mxu1 }
 0x7a0   : > { %v1358_v41 = vadd.f32 %v1718_v39, %v1357_v40 }
 0x7a1   : > { %v1854_v42 = vpop.f32.mrf.mxu1 }
 0x7a2   : > { %v1363_v43 = vmax.f32 %v1358_v41, 0.0 }
 0x7a3   : > { %v1360_v44 = vpop.f32.mrf.mxu1 }
 0x7a4   : > { %v1364_v45 = vpack.c.bf16 %v1363_v43, %v1363_v43 }
 0x7a5   : > { %v1855_v46 = vpop.f32.mrf.mxu1 }
 0x7a6   : > { %1873 = vmatmul.mubr.bf16.vlgmr.msra.gmra.mxu0 %v1364_v45 }
 0x866   : > { %v1470_v0 = vpop.f32.mrf.mxu0 }
 0x867   : > { %v1471_v48 = vadd.f32 %v1722_v47, %v1470_v0 }
 0x868   : > { %v1874_v49 = vpop.f32.mrf.mxu0 }
 0x869   : > { %v1476_v50 = vadd.f32 %v1471_v48, %v1295_v35 }
 0x86a   : > { %v1473_v51 = vpop.f32.mrf.mxu0 }
 0x86b   : > { %v1477_v52 = vsel %vm614_vm1, %v1476_v50, 0.0 }
 0x86c   : > { %1478 = vadd.xlane.f32.xlu0 %v1477_v52  ;;  %v1875_v53 = vpop.f32.mrf.mxu0 }
 0x8f5   : > { %v1479_v54 = vpop.xlane.xlu0 %1478 }
 0x8f6   : > { %v1480_v55 = vmul.f32 0.03125, %v1479_v54 }
 0x8f8   : > { %v1481_v56 = vsub.f32 %v1476_v50, %v1480_v55 }
 0x8fa   : > { %v1482_v57 = vmul.f32 %v1481_v56, %v1481_v56 }
 0x8fc   : > { %v1483_v58 = vsel %vm614_vm1, %v1482_v57, 0.0 }
 0x8fd   : > { %1484 = vadd.xlane.f32.xlu1 %v1483_v58 }
 0x8fe   : > { %2110 = shalt.err (!%p2107_p1)
}
 0x8ff   : > { %s2111_s23 = scalar_lea.hbm %s2612_s20, 512  ;;  %s2115_s27 = scalar_lea.hbm %s2696_s15, 1024 }
 0x900   : > { %p2112_p5 = scmp.ne.s32.totalorder %s2612_s20, %s2111_s23  ;;  %p2116_p6 = scmp.lt.s32.totalorder %s2612_s20, %s2696_s15 }
 0x901   : > { %p2117_p0 = scmp.lt.s32.totalorder %s2115_s27, %s2111_s23 }
 0x902   : > { %p2113_p2 = pnand %p2112_p5, %p2354_p4 }
 0x903   : > { %p2118_p10 = por %p2117_p0, %p2116_p6 }
 0x904   : > { %p2114_p3 = pneg %p2113_p2 }
 0x906   : > { %p2119_p11 = pnand %p2118_p10, %p2114_p3 }
 0x908   : > { %2122 = shalt.err (!%p2119_p11)
}
 0x909   : > { %s2232_s29 = smov 128   ;;  %s2718_s14 = scalar_lea.sflag [#allocation10], %s2507_s22 }
 0x90a   : > { %1889 = dma.vmem_to_hbm [thread:$0]  (%p2354_p4), %s2607_s17, 512, %s2612_s20, %s2718_s14, %s2232_s29, %s2232_s29, %s2228_s24  }
 0x90b   : > { %s1689_s16 = sshll.u32 %s2507_s22, 3  ;;  %s1733_s26 = sshll.u32 %s2203_s21, 7 }
 0x90c   : > { %s566_s23 = scalar_lea.vmem [#allocation8], %s1689_s16  ;;  %s2719_s30 = sld [smem:[#allocation22_spill]] }
 0x90d   : > { %s1513_s18 = sshll.u32 %s566_s23, 4  ;;  %s1494_s17 = scalar_lea.sflag [#allocation4], %s2507_s22  ;;  %s1514_s18 = int_to_ptr.vmem [resolvable:$true] %s1513_s18 }
 0x90e   : > { %s2123_s20 = scalar_lea.vmem %s1514_s18, 128  ;;  %s2233_s21 = smov [#allocation8]  }
 0x90f   : > { %p2124_p13 = scmp.ne.s32.totalorder %s1514_s18, %s2123_s20  ;;  %s2127_s29 = sshll.u32 %s2233_s21, 4  ;;  %s2128_s29 = int_to_ptr.vmem [resolvable:$false] %s2127_s29 }
 0x910   : > { %s2129_s14 = scalar_lea.vmem %s2128_s29, 256  ;;  %p2130_p12 = scmp.lt.s32.totalorder %s1514_s18, %s2128_s29 }
 0x911   : > { %p2125_p7 = pnand %p2124_p13, %p2354_p4  ;;  %p2131_p1 = scmp.lt.s32.totalorder %s2129_s14, %s2123_s20 }
 0x912   : > { %s1511_s24 = scalar_lea.hbm %s2719_s30, %s1733_s26 }
 0x913   : > { %p2126_p9 = pneg %p2125_p7  ;;  %p2132_p5 = por %p2131_p1, %p2130_p12 }
 0x915   : > { %p2133_p2 = pnand %p2132_p5, %p2126_p9 }
 0x986   : > { %v1485_v59 = vpop.xlane.xlu1 %1484 }
 0x987   : > { %v1486_v60 = vmul.f32 0.03125, %v1485_v59 }
 0x989   : > { %v1487_v61 = vadd.f32 1e-05, %v1486_v60 }
 0x98b   : > { %2017 = vrsqrt.f32 %v1487_v61 }
 0x998   : > { %v2018_v62 = vpop.eup %2017 }
 0x999   : > { %v1489_v63 = vmul.f32 %v2018_v62, %v1481_v56 }
 0x99b   : > { %v1490_v1 = vmul.f32 %v2583_v31, %v1489_v63 }
 0x99d   : > { %v1491_v2 = vadd.f32 %v2588_v33, %v1490_v1 }
 0x99f   : > { %1492 = vst.msk [vmem:[%s566_s23] sm:$0xff] %vm614_vm1, %v1491_v2 }
 0x9a0   : > { %2136 = shalt.err (!%p2133_p2)
}
 0x9a1   : > { %s2137_s16 = scalar_lea.hbm %s1511_s24, 128  ;;  %s2141_s23 = scalar_lea.hbm %s2719_s30, 256 }
 0x9a2   : > { %p2138_p3 = scmp.ne.s32.totalorder %s1511_s24, %s2137_s16  ;;  %p2142_p10 = scmp.lt.s32.totalorder %s1511_s24, %s2719_s30 }
 0x9a3   : > { %p2143_p11 = scmp.lt.s32.totalorder %s2141_s23, %s2137_s16 }
 0x9a4   : > { %p2139_p6 = pnand %p2138_p3, %p2354_p4 }
 0x9a5   : > { %p2144_p13 = por %p2143_p11, %p2142_p10 }
 0x9a6   : > { %p2140_p0 = pneg %p2139_p6 }
 0x9a8   : > { %p2145_p7 = pnand %p2144_p13, %p2140_p0 }
 0x9aa   : > { %2148 = shalt.err (!%p2145_p7)
}
 0x9ab   : > { %1888 = dma.vmem_to_hbm [thread:$0]  (%p2354_p4), %s1514_s18, 128, %s1511_s24, %s1494_s17  }
 0x9ac PF: > { %s2720_s20 = sld [smem:[#allocation18_spill]] }
 0x9ad   : > { %s2721_s21 = sld [smem:[#allocation15_spill]] }
 0x9b2   : > { %p1915_p9 = scmp.ge.s32.totalorder %s2720_s20, 2 }
 0x9b3   : > { %s1542_s14 = sand.u32 1, %s2721_s21  }
 0x9b4   : > { %p1903_p12 = pnand %p1915_p9, %p2361_p8  ;;  %s1543_s22 = scalar_lea.sflag [#allocation4], %s1542_s14 }
 0x9b6   : > { %p1904_p1 = pneg %p1903_p12 }
 0x9b8   : > { %2182 = dma.done.wait (%p1904_p1), %s1543_s22, 128  }
 0x9b9   : > { %2184 = vsyncadd (%p1904_p1), %s1543_s22, 4294967168  ;;  %s1552_s26 = scalar_lea.sflag [#allocation10], %s1542_s14 }
 0x9ba   : > { %2186 = dma.done.wait (%p1904_p1), %s1552_s26, 512  }
 0x9bb   : > { %2188 = vsyncadd (%p1904_p1), %s1552_s26, 4294966784  ;;  %s34_s23 = sadd.s32 1, %s2720_s20   ;;  %s2723_s28 = sld [smem:[#allocation16_spill]] }
 0x9bc   : > { %p31_p5 = scmp.ge.s32.totalorder %s34_s23, 4   ;;  %s2724_s20 = sld [smem:[#allocation21_spill]] }
 0x9bd   : > { %s2725_s21 = sld [smem:[#allocation17_spill]]  ;;  %s2727_s18 = smov %s2195_s19 }
 0x9be   : > { %s2726_s22 = sld [smem:[#allocation19_spill]]  ;;  %33 = sbr.rel (!%p31_p5) target bundleno = 10 (0xa), region = 147 }
 0x9c1   : > { %s2728_s19 = smov %s2723_s28 }
 0x9c3   :  { %1557 = vsyncpa [#allocation3], 1 }
 0x9c4   :  { %1559 = vsyncpa [#allocation3 + $0x1], 1 }
 0x9c5   :  { %1560 = vsyncpa [#allocation6], 1 }
 0x9c6   :  { %1561 = vsyncpa [#allocation4], 1 }
 0x9c7   :  { %1563 = vsyncpa [#allocation4 + $0x1], 1 }
 0x9c8   :  { %1564 = vsyncpa [#allocation10], 1 }
 0x9c9   :  { %1566 = vsyncpa [#allocation10 + $0x1], 1 }

</bundles_post_ra>
